<compile_context>
chip_gen: v5e
topology: v5e:2x2
jax: 0.10.0
libtpu: 0.0.40
codegen_flags: <defaults>
</compile_context>

<pallas_src>
import functools

import jax
import jax.numpy as jnp
from jax import lax
from jax.experimental import pallas as pl
from jax.experimental.pallas import tpu as pltpu

LANE = 128
IN_FEATURES = 28 * 28  # 784


def _round_up(x, m):
    return ((x + m - 1) // m) * m


def _mlp_softmax_kernel(x_ref, w1_ref, b1_ref, w2_ref, b2_ref, w3_ref, b3_ref,
                        o_ref, *, n_valid, with_softmax):
    # x tile: (TM, 784) at source dtype (typically f32).  Cast to bf16 in VMEM
    # right before the MXU — avoids a separate XLA cast pass over HBM.
    x = x_ref[...].astype(jnp.bfloat16)

    h1 = jnp.dot(x, w1_ref[...], preferred_element_type=jnp.float32)
    h1 = jnp.maximum(h1 + b1_ref[...], 0.0)                       # (TM, 128) f32

    h2 = jnp.dot(h1.astype(jnp.bfloat16), w2_ref[...],
                 preferred_element_type=jnp.float32)
    h2 = jnp.maximum(h2 + b2_ref[...], 0.0)                       # (TM, 128) f32

    logits = jnp.dot(h2.astype(jnp.bfloat16), w3_ref[...],
                     preferred_element_type=jnp.float32)
    logits = logits + b3_ref[...]                                 # (TM, 128) f32

    if with_softmax:
        # Mask padded logit lanes so they contribute exp(.) == 0 to the sum.
        lane = lax.broadcasted_iota(jnp.int32, logits.shape, dimension=1)
        masked = jnp.where(lane < n_valid, logits, jnp.float32(-1e30))
        m = jnp.max(masked, axis=-1, keepdims=True)
        e = jnp.exp(masked - m)
        denom = jnp.sum(e, axis=-1, keepdims=True)
        out = e * pl.reciprocal(denom, approx=True)
    else:
        out = logits
    o_ref[...] = out.astype(o_ref.dtype)


def prepare_params(params):
    """Pad hidden/output dims to 128 lanes; weights -> bf16, biases -> f32.

    Input params: (w1, b1, w2, b2, w3, b3) with shapes
      w1 (784,120) b1 (1,120) w2 (120,84) b2 (1,84) w3 (84,N) b3 (1,N)
    NOTE: do NOT pad IN_FEATURES (K=784) — the kernel is HBM-bound and
    K-padding x would only add bytes.
    """
    w1, b1, w2, b2, w3, b3 = params
    n = w3.shape[1]

    def pad2(a, rows, cols):
        return jnp.pad(a, ((0, rows - a.shape[0]), (0, cols - a.shape[1])))

    w1p = pad2(w1, IN_FEATURES, LANE).astype(jnp.bfloat16)
    b1p = pad2(b1, 1, LANE).astype(jnp.float32)
    w2p = pad2(w2, LANE, LANE).astype(jnp.bfloat16)
    b2p = pad2(b2, 1, LANE).astype(jnp.float32)
    w3p = pad2(w3, LANE, LANE).astype(jnp.bfloat16)
    b3p = pad2(b3, 1, LANE).astype(jnp.float32)
    return (w1p, b1p, w2p, b2p, w3p, b3p), n


def mnist_classifier_forward(x, params, *, with_softmax=True, tm=2048,
                             out_dtype=jnp.float32):
    """Forward pass matching MNIST_Classifier.forward.

    x: (B, 1, 28, 28) (NCHW) or anything that flattens to (B, 784).
    params: raw (in, out)-layout linear params (see init_params).
    Returns (B, N) probabilities (or logits); leading dim squeezed if B == 1.
    out_dtype: set to jnp.bfloat16 to halve output HBM traffic if the consumer
    tolerates bf16 probabilities.
    """
    (w1, b1, w2, b2, w3, b3), n = prepare_params(params)

    B = x.shape[0]
    x2d = x.reshape(B, IN_FEATURES)   # layout-only reshape; no cast, no pad

    # Batch tile: large enough to amortize the ~0.35 us per-grid-step overhead,
    # small enough to fit double-buffered in scoped VMEM everywhere.
    tm_eff = min(tm, _round_up(B, 8))
    # Keep >= 2 grid steps when B allows it so the "parallel" axis can shard
    # across v7x's two TensorCores (no-op on single-TC chips).
    if B >= 16 and pl.cdiv(B, tm_eff) < 2:
        tm_eff = _round_up(pl.cdiv(B, 2), 8)
    grid = (pl.cdiv(B, tm_eff),)      # ragged last tile; OOB writes are masked

    kernel = functools.partial(_mlp_softmax_kernel, n_valid=n,
                               with_softmax=with_softmax)

    const = lambda i: (0, 0)  # weights/biases resident across all batch tiles
    in_specs = [
        pl.BlockSpec((tm_eff, IN_FEATURES), lambda i: (i, 0)),
        pl.BlockSpec((IN_FEATURES, LANE), const),
        pl.BlockSpec((1, LANE), const),
        pl.BlockSpec((LANE, LANE), const),
        pl.BlockSpec((1, LANE), const),
        pl.BlockSpec((LANE, LANE), const),
        pl.BlockSpec((1, LANE), const),
    ]
    out_specs = pl.BlockSpec((tm_eff, LANE), lambda i: (i, 0))

    x_bytes = B * IN_FEATURES * jnp.dtype(x2d.dtype).itemsize
    weight_bytes = (IN_FEATURES * LANE + 2 * LANE * LANE) * 2 + 3 * LANE * 4
    out_bytes = B * LANE * jnp.dtype(out_dtype).itemsize
    cost = pl.CostEstimate(
        flops=2 * B * (IN_FEATURES * LANE + LANE * LANE + LANE * LANE),
        transcendentals=B * LANE if with_softmax else 0,
        bytes_accessed=x_bytes + weight_bytes + out_bytes,
    )

    out = pl.pallas_call(
        kernel,
        out_shape=jax.ShapeDtypeStruct((B, LANE), out_dtype),
        grid=grid,
        in_specs=in_specs,
        out_specs=out_specs,
        compiler_params=pltpu.CompilerParams(
            dimension_semantics=("parallel",),
            # tm=2048 f32 x tile double-buffered (~12.5 MiB) + out + weights
            # needs more than v5e's 16 MiB scoped default; ~15 MiB actual.
            vmem_limit_bytes=48 * 1024 * 1024,
        ),
        cost_estimate=cost,
    )(x2d, w1, b1, w2, b2, w3, b3)

    out = out[:, :n]
    # torch's .squeeze(0): only squeezes if the leading dim is 1.
    if B == 1:
        out = out[0]
    return out


def init_params(key, N=10):
    """Deterministic synthetic parameters with the module's shapes.

    nn.Linear(784,120), nn.Linear(120,84), nn.Linear(84,N); weights kept
    transposed as (in, out), biases as (1, out).
    """
    k1, k2, k3, k4, k5, k6 = jax.random.split(key, 6)

    def lin(kw, kb, fan_in, fan_out):
        bound = 1.0 / jnp.sqrt(fan_in)
        w = jax.random.uniform(kw, (fan_in, fan_out), jnp.float32, -bound, bound)
        b = jax.random.uniform(kb, (1, fan_out), jnp.float32, -bound, bound)
        return w, b

    w1, b1 = lin(k1, k2, IN_FEATURES, 120)
    w2, b2 = lin(k3, k4, 120, 84)
    w3, b3 = lin(k5, k6, 84, N)
    return (w1, b1, w2, b2, w3, b3)


if __name__ == "__main__":
    key = jax.random.PRNGKey(0)
    kp, kx, kx2 = jax.random.split(key, 3)

    N = 10
    params = init_params(kp, N=N)
    w1, b1, w2, b2, w3, b3 = params

    def ref_forward(xin, softmax=True):
        xf = xin.reshape(xin.shape[0], -1)
        hf = jnp.maximum(xf @ w1 + b1, 0.0)
        hf = jnp.maximum(hf @ w2 + b2, 0.0)
        logits = hf @ w3 + b3
        return jax.nn.softmax(logits, axis=1) if softmax else logits

    # Small MNIST-like batch: NCHW (2, 1, 28, 28).
    x = jax.random.uniform(kx, (2, 1, 28, 28), jnp.float32)

    out = jax.block_until_ready(
        mnist_classifier_forward(x, params, with_softmax=True))
    assert out.shape == (2, N), out.shape

    # Reference 1: same padded/bf16 math in pure JAX (isolates only the
    # approx-reciprocal and store-path differences).
    (w1p, b1p, w2p, b2p, w3p, b3p), _ = prepare_params(params)
    xb = x.reshape(x.shape[0], -1).astype(jnp.bfloat16)
    h = jnp.maximum(jnp.dot(xb, w1p, preferred_element_type=jnp.float32) + b1p, 0.0)
    h = jnp.maximum(jnp.dot(h.astype(jnp.bfloat16), w2p,
                            preferred_element_type=jnp.float32) + b2p, 0.0)
    logits_bf16 = jnp.dot(h.astype(jnp.bfloat16), w3p,
                          preferred_element_type=jnp.float32) + b3p
    ref_bf16 = jax.nn.softmax(logits_bf16[:, :N], axis=-1)
    assert jnp.allclose(out, ref_bf16, atol=5e-3, rtol=5e-3), (
        jnp.max(jnp.abs(out - ref_bf16)))

    # Reference 2: full-precision torch-equivalent math (loose tolerance for
    # the bf16 MXU operands).
    ref_f32 = ref_forward(x)
    assert jnp.allclose(out, ref_f32, atol=2e-2), (
        jnp.max(jnp.abs(out - ref_f32)))
    assert jnp.allclose(jnp.sum(out, axis=-1), 1.0, atol=5e-3)

    # B == 1 squeeze path.
    out1 = jax.block_until_ready(
        mnist_classifier_forward(x[:1], params, with_softmax=True))
    assert out1.shape == (N,), out1.shape

    # No-softmax (logits) path.
    logits_out = jax.block_until_ready(
        mnist_classifier_forward(x, params, with_softmax=False))
    assert logits_out.shape == (2, N), logits_out.shape
    assert jnp.allclose(logits_out, ref_forward(x, softmax=False),
                        atol=2e-2), "logits mismatch"

    # Ragged batch + 2-tile (megacore split) path: B=20 -> tm=16, grid=2,
    # last tile ragged (exercises OOB read padding / masked writeback).
    x20 = jax.random.uniform(kx2, (20, 1, 28, 28), jnp.float32)
    out20 = jax.block_until_ready(
        mnist_classifier_forward(x20, params, with_softmax=True))
    assert out20.shape == (20, N), out20.shape
    assert jnp.allclose(out20, ref_forward(x20), atol=2e-2), (
        jnp.max(jnp.abs(out20 - ref_forward(x20))))
    assert jnp.allclose(jnp.sum(out20, axis=-1), 1.0, atol=5e-3)

    print("KERNEL_OK")
</pallas_src>

<mosaic_0001>
module attributes {stable_mosaic.version = 11 : i64} {
  func.func @_mlp_softmax_kernel(%arg0: i32, %arg1: memref<8x784xf32, #tpu.memory_space<vmem>>, %arg2: memref<784x128xbf16, #tpu.memory_space<vmem>>, %arg3: memref<1x128xf32, #tpu.memory_space<vmem>>, %arg4: memref<128x128xbf16, #tpu.memory_space<vmem>>, %arg5: memref<1x128xf32, #tpu.memory_space<vmem>>, %arg6: memref<128x128xbf16, #tpu.memory_space<vmem>>, %arg7: memref<1x128xf32, #tpu.memory_space<vmem>>, %arg8: memref<8x128xf32, #tpu.memory_space<vmem>>) attributes {dimension_semantics = [#tpu.dimension_semantics<parallel>], iteration_bounds = array<i64: 1>, scalar_prefetch = 0 : i64, scratch_operands = 0 : i64, tpu.core_type = #tpu.core_type<tc>, window_params = [{transform_indices = @transform_0, window_bounds = array<i64: 8, 784>}, {pipeline_mode = #tpu.pipeline_mode<synchronous>, transform_indices = @transform_1, window_bounds = array<i64: 784, 128>}, {pipeline_mode = #tpu.pipeline_mode<synchronous>, transform_indices = @transform_2, window_bounds = array<i64: 1, 128>}, {pipeline_mode = #tpu.pipeline_mode<synchronous>, transform_indices = @transform_3, window_bounds = array<i64: 128, 128>}, {pipeline_mode = #tpu.pipeline_mode<synchronous>, transform_indices = @transform_4, window_bounds = array<i64: 1, 128>}, {pipeline_mode = #tpu.pipeline_mode<synchronous>, transform_indices = @transform_5, window_bounds = array<i64: 128, 128>}, {pipeline_mode = #tpu.pipeline_mode<synchronous>, transform_indices = @transform_6, window_bounds = array<i64: 1, 128>}, {transform_indices = @transform_7, window_bounds = array<i64: 8, 128>}]} {
    %c0 = arith.constant 0 : index
    %c0_0 = arith.constant 0 : index
    %0 = vector.load %arg1[%c0, %c0_0] : memref<8x784xf32, #tpu.memory_space<vmem>>, vector<8x784xf32>
    %1 = arith.truncf %0 : vector<8x784xf32> to vector<8x784xbf16>
    %c0_1 = arith.constant 0 : index
    %c0_2 = arith.constant 0 : index
    %2 = vector.load %arg2[%c0_1, %c0_2] : memref<784x128xbf16, #tpu.memory_space<vmem>>, vector<784x128xbf16>
    %cst = arith.constant dense<0.000000e+00> : vector<8x128xf32>
    %3 = tpu.matmul %1, %2, %cst {dimension_numbers = #tpu.dot_dimension_numbers<[1], [0], [0], [1], [0, 0, 1, 1], [], []>} : vector<8x784xbf16>, vector<784x128xbf16>, vector<8x128xf32> -> vector<8x128xf32>
    %c0_3 = arith.constant 0 : index
    %c0_4 = arith.constant 0 : index
    %4 = vector.load %arg3[%c0_3, %c0_4] : memref<1x128xf32, #tpu.memory_space<vmem>>, vector<1x128xf32>
    %5 = vector.broadcast %4 : vector<1x128xf32> to vector<8x128xf32>
    %6 = arith.addf %3, %5 : vector<8x128xf32>
    %cst_5 = arith.constant 0.000000e+00 : f32
    %7 = vector.broadcast %cst_5 : f32 to vector<8x128xf32>
    %8 = arith.maximumf %6, %7 : vector<8x128xf32>
    %9 = arith.truncf %8 : vector<8x128xf32> to vector<8x128xbf16>
    %c0_6 = arith.constant 0 : index
    %c0_7 = arith.constant 0 : index
    %10 = vector.load %arg4[%c0_6, %c0_7] : memref<128x128xbf16, #tpu.memory_space<vmem>>, vector<128x128xbf16>
    %cst_8 = arith.constant dense<0.000000e+00> : vector<8x128xf32>
    %11 = tpu.matmul %9, %10, %cst_8 {dimension_numbers = #tpu.dot_dimension_numbers<[1], [0], [0], [1], [0, 0, 1, 1], [], []>} : vector<8x128xbf16>, vector<128x128xbf16>, vector<8x128xf32> -> vector<8x128xf32>
    %c0_9 = arith.constant 0 : index
    %c0_10 = arith.constant 0 : index
    %12 = vector.load %arg5[%c0_9, %c0_10] : memref<1x128xf32, #tpu.memory_space<vmem>>, vector<1x128xf32>
    %13 = vector.broadcast %12 : vector<1x128xf32> to vector<8x128xf32>
    %14 = arith.addf %11, %13 : vector<8x128xf32>
    %cst_11 = arith.constant 0.000000e+00 : f32
    %15 = vector.broadcast %cst_11 : f32 to vector<8x128xf32>
    %16 = arith.maximumf %14, %15 : vector<8x128xf32>
    %17 = arith.truncf %16 : vector<8x128xf32> to vector<8x128xbf16>
    %c0_12 = arith.constant 0 : index
    %c0_13 = arith.constant 0 : index
    %18 = vector.load %arg6[%c0_12, %c0_13] : memref<128x128xbf16, #tpu.memory_space<vmem>>, vector<128x128xbf16>
    %cst_14 = arith.constant dense<0.000000e+00> : vector<8x128xf32>
    %19 = tpu.matmul %17, %18, %cst_14 {dimension_numbers = #tpu.dot_dimension_numbers<[1], [0], [0], [1], [0, 0, 1, 1], [], []>} : vector<8x128xbf16>, vector<128x128xbf16>, vector<8x128xf32> -> vector<8x128xf32>
    %c0_15 = arith.constant 0 : index
    %c0_16 = arith.constant 0 : index
    %20 = vector.load %arg7[%c0_15, %c0_16] : memref<1x128xf32, #tpu.memory_space<vmem>>, vector<1x128xf32>
    %21 = vector.broadcast %20 : vector<1x128xf32> to vector<8x128xf32>
    %22 = arith.addf %19, %21 : vector<8x128xf32>
    %23 = tpu.iota {dimensions = array<i32: 1>} : vector<8x128xi32>
    %c10_i32 = arith.constant 10 : i32
    %24 = vector.broadcast %c10_i32 : i32 to vector<8x128xi32>
    %25 = arith.cmpi slt, %23, %24 : vector<8x128xi32>
    %cst_17 = arith.constant -1.000000e+30 : f32
    %26 = vector.broadcast %cst_17 : f32 to vector<8x128xf32>
    %27 = arith.select %25, %22, %26 : vector<8x128xi1>, vector<8x128xf32>
    %cst_18 = arith.constant dense<0xFF800000> : vector<8xf32>
    %28 = vector.multi_reduction <maximumf>, %27, %cst_18 [1] : vector<8x128xf32> to vector<8xf32>
    %29 = vector.shape_cast %28 : vector<8xf32> to vector<8x1xf32>
    %30 = vector.broadcast %29 : vector<8x1xf32> to vector<8x128xf32>
    %31 = arith.subf %27, %30 : vector<8x128xf32>
    %32 = math.exp %31 : vector<8x128xf32>
    %cst_19 = arith.constant dense<0.000000e+00> : vector<8xf32>
    %33 = vector.multi_reduction <add>, %32, %cst_19 [1] : vector<8x128xf32> to vector<8xf32>
    %34 = vector.shape_cast %33 : vector<8xf32> to vector<8x1xf32>
    %35 = tpu.reciprocal %34 {approx = true} : vector<8x1xf32> -> vector<8x1xf32>
    %36 = vector.broadcast %35 : vector<8x1xf32> to vector<8x128xf32>
    %37 = arith.mulf %32, %36 : vector<8x128xf32>
    %c0_20 = arith.constant 0 : index
    %c0_21 = arith.constant 0 : index
    %38 = vector.load %arg8[%c0_20, %c0_21] : memref<8x128xf32, #tpu.memory_space<vmem>>, vector<8x128xf32>
    tpu.vector_store %arg8[%c0_20, %c0_21], %37 {strides = array<i32>} : memref<8x128xf32, #tpu.memory_space<vmem>>, vector<8x128xf32>,
    return
  }
  func.func @transform_0(%arg0: i32) -> (i32, i32) {
    %c0_i32 = arith.constant 0 : i32
    %c0_i32_0 = arith.constant 0 : i32
    return %arg0, %c0_i32 : i32, i32
  }
  func.func @transform_1(%arg0: i32) -> (i32, i32) {
    %c0_i32 = arith.constant 0 : i32
    %c0_i32_0 = arith.constant 0 : i32
    %c0_i32_1 = arith.constant 0 : i32
    return %c0_i32, %c0_i32_0 : i32, i32
  }
  func.func @transform_2(%arg0: i32) -> (i32, i32) {
    %c0_i32 = arith.constant 0 : i32
    %c0_i32_0 = arith.constant 0 : i32
    %c0_i32_1 = arith.constant 0 : i32
    return %c0_i32, %c0_i32_0 : i32, i32
  }
  func.func @transform_3(%arg0: i32) -> (i32, i32) {
    %c0_i32 = arith.constant 0 : i32
    %c0_i32_0 = arith.constant 0 : i32
    %c0_i32_1 = arith.constant 0 : i32
    return %c0_i32, %c0_i32_0 : i32, i32
  }
  func.func @transform_4(%arg0: i32) -> (i32, i32) {
    %c0_i32 = arith.constant 0 : i32
    %c0_i32_0 = arith.constant 0 : i32
    %c0_i32_1 = arith.constant 0 : i32
    return %c0_i32, %c0_i32_0 : i32, i32
  }
  func.func @transform_5(%arg0: i32) -> (i32, i32) {
    %c0_i32 = arith.constant 0 : i32
    %c0_i32_0 = arith.constant 0 : i32
    %c0_i32_1 = arith.constant 0 : i32
    return %c0_i32, %c0_i32_0 : i32, i32
  }
  func.func @transform_6(%arg0: i32) -> (i32, i32) {
    %c0_i32 = arith.constant 0 : i32
    %c0_i32_0 = arith.constant 0 : i32
    %c0_i32_1 = arith.constant 0 : i32
    return %c0_i32, %c0_i32_0 : i32, i32
  }
  func.func @transform_7(%arg0: i32) -> (i32, i32) {
    %c0_i32 = arith.constant 0 : i32
    %c0_i32_0 = arith.constant 0 : i32
    return %arg0, %c0_i32 : i32, i32
  }
}

</mosaic_0001>

<bundles_post_ra>
// kernel: tpu_custom_call.1
= control target key start
LH: loop header
LB: loop body
LE: loop exit
PB: predicated region body
PF: predicated region fallthrough
CT: control target
= control target key end

     0   :  { %12 = vsyncpa [#allocation3], 0  ;;  %s1382_s0 = inlined_call_operand.hbm [shape: f32[2,784], index: 0, kind: input, shape index: {}]   ;;  %s1383_s1 = inlined_call_operand.hbm [shape: bf16[784,128], index: 1, kind: input, shape index: {}]   ;;  %s1384_s2 = inlined_call_operand.vmem [shape: f32[1,128], index: 2, kind: input, shape index: {}]   ;;  %s1385_s3 = inlined_call_operand.hbm [shape: bf16[128,128], index: 3, kind: input, shape index: {}]   ;;  %s1386_s4 = inlined_call_operand.vmem [shape: f32[1,128], index: 4, kind: input, shape index: {}]   ;;  %s1387_s5 = inlined_call_operand.hbm [shape: bf16[128,128], index: 5, kind: input, shape index: {}]   ;;  %s1388_s6 = inlined_call_operand.vmem [shape: f32[1,128], index: 6, kind: input, shape index: {}]   ;;  %s1389_s7 = inlined_call_operand.hbm [shape: f32[2,128], index: 7, kind: output, shape index: {}]  }
   0x1   :  { %13 = vsyncpa [#allocation6], 0 }
   0x2   :  { %14 = vsyncpa [#allocation9], 0 }
   0x3   :  { %15 = vsyncpa [#allocation4], 0  ;;  %s33_s26 = sshll.u32 %s1383_s1, 4  ;;  %s34_s26 = int_to_ptr.hbm [resolvable:$true] %s33_s26 }
   0x4   :  { %19 = vsyncadd [#allocation3], 672  ;;  %s1307_s27 = smov [#allocation5]   ;;  %s20_s8 = sshll.u32 %s1382_s0, 4  ;;  %s21_s8 = int_to_ptr.hbm [resolvable:$true] %s20_s8 }
   0x5   :  { %s35_s28 = sshll.u32 %s1307_s27, 4  ;;  %s1308_s9 = smov 64   ;;  %s36_s28 = int_to_ptr.vmem [resolvable:$true] %s35_s28 }
   0x6   :  { %s1309_s10 = smov 4   ;;  %s1310_s11 = smov [#allocation2]  }
   0x7   :  { %41 = dma.hbm_to_vmem [thread:$0]  %s34_s26, 6272, %s36_s28, [#allocation6], %s1308_s9, %s1308_s9, %s1309_s10  }
   0x8   :  { %s22_s12 = sshll.u32 %s1310_s11, 4  ;;  %s1311_s13 = smov 224   ;;  %s23_s12 = int_to_ptr.vmem [resolvable:$true] %s22_s12 }
   0x9   :  { %s1312_s14 = smov 14   ;;  %s48_s16 = sshll.u32 %s1385_s3, 4  ;;  %s49_s16 = int_to_ptr.hbm [resolvable:$true] %s48_s16 }
   0xa   :  { %28 = dma.hbm_to_vmem [thread:$0]  %s21_s8, 224, %s23_s12, [#allocation3], %s1311_s13, %s1311_s13, %s1312_s14  }
   0xb   :  { %s1313_s17 = smov [#allocation7]   ;;  %s63_s20 = sshll.u32 %s1387_s5, 4  ;;  %s64_s20 = int_to_ptr.hbm [resolvable:$true] %s63_s20 }
   0xc   :  { %s50_s18 = sshll.u32 %s1313_s17, 4  ;;  %s1314_s21 = smov [#allocation8]   ;;  %s51_s18 = int_to_ptr.vmem [resolvable:$true] %s50_s18 }
   0xd   :  { %56 = dma.hbm_to_vmem [thread:$0]  %s49_s16, 1024, %s51_s18, [#allocation6], %s1308_s9, %s1308_s9, %s1309_s10  }
   0xe   :  { %s65_s22 = sshll.u32 %s1314_s21, 4  ;;  %s66_s22 = int_to_ptr.vmem [resolvable:$true] %s65_s22 }
   0xf   :  { %71 = dma.hbm_to_vmem [thread:$0]  %s64_s20, 1024, %s66_s22, [#allocation9], %s1308_s9, %s1308_s9, %s1309_s10  }
  0x10   :  { %1299 = dma.done.wait [#allocation3], 896  }
  0x11   :  { %1300 = vsyncadd [#allocation3], 4294966400 }
  0x12   :  { %1301 = dma.done.wait [#allocation6], 7296  }
  0x13   :  { %1302 = vsyncadd [#allocation6], 4294960000 }
  0x14   :  { %1303 = dma.done.wait [#allocation9], 1024  }
  0x15   :  { %1304 = vsyncadd [#allocation9], 4294966272  ;;  %v1103_v0 = vld [vmem:[#allocation5 + $0x38] sm:$0xff]  ;;  %v1102_v3 = vld [vmem:[#allocation5 + $0x30] sm:$0xff]  ;;  %vm539_vm0 = vcmask 130048  }
  0x16   :  { %v1111_v1 = vld [vmem:[#allocation5 + $0x78] sm:$0xff]  ;;  %543 = vmatpush.bf16.msra.mxu0 %v1103_v0  ;;  %v1110_v4 = vld [vmem:[#allocation5 + $0x70] sm:$0xff]  ;;  %v1101_v8 = vld [vmem:[#allocation5 + $0x28] sm:$0xff] }
  0x17   :  { %v1119_v2 = vld [vmem:[#allocation5 + $0xb8] sm:$0xff]  ;;  %556 = vmatpush.bf16.msra.mxu1 %v1111_v1  ;;  %v1118_v5 = vld [vmem:[#allocation5 + $0xb0] sm:$0xff]  ;;  %v1109_v9 = vld [vmem:[#allocation5 + $0x68] sm:$0xff] }
  0x18   :  { %569 = vmatpush.bf16.msra.mxu2 %v1119_v2  ;;  %v1127_v6 = vld [vmem:[#allocation5 + $0xf8] sm:$0xff]  ;;  %v1126_v7 = vld [vmem:[#allocation5 + $0xf0] sm:$0xff]  ;;  %v1117_v10 = vld [vmem:[#allocation5 + $0xa8] sm:$0xff] }
  0x19   :  { %582 = vmatpush.bf16.msra.mxu3 %v1127_v6  ;;  %v1125_v11 = vld [vmem:[#allocation5 + $0xe8] sm:$0xff]  ;;  %v1100_v12 = vld [vmem:[#allocation5 + $0x20] sm:$0xff]  ;;  %v93_v16 = vld [vmem:[#allocation2 + $0xe] sm:$0xff] }
  0x1a   :  { %544 = vmatpush.bf16.msra.mxu0 %v1102_v3  ;;  %v1108_v13 = vld [vmem:[#allocation5 + $0x60] sm:$0xff]  ;;  %v91_v15 = vld [vmem:[#allocation2] sm:$0xff]  ;;  %v97_v18 = vld [vmem:[#allocation2 + $0x2a] sm:$0xff]  ;;  %109 = vst [vmem:[#allocation1 + $0x1] ss:$4 sm:$0xff] %v93_v16 }
  0x1b   :  { %557 = vmatpush.bf16.msra.mxu1 %v1110_v4  ;;  %v1116_v14 = vld [vmem:[#allocation5 + $0xa0] sm:$0xff]  ;;  %107 = vst [vmem:[#allocation1] ss:$4 sm:$0xff] %v91_v15  ;;  %v1099_v20 = vld [vmem:[#allocation5 + $0x18] sm:$0xff]  ;;  %v1098_v23 = vld [vmem:[#allocation5 + $0x10] sm:$0xff] }
  0x1c   :  { %570 = vmatpush.bf16.msra.mxu2 %v1118_v5  ;;  %v95_v17 = vld [vmem:[#allocation2 + $0x1c] sm:$0xff]  ;;  %v1107_v21 = vld [vmem:[#allocation5 + $0x58] sm:$0xff]  ;;  %113 = vst [vmem:[#allocation1 + $0x3] ss:$4 sm:$0xff] %v97_v18  ;;  %v92_v24 = vld [vmem:[#allocation2 + $0x8] sm:$0x3f] }
  0x1d   :  { %583 = vmatpush.bf16.msra.mxu3 %v1126_v7  ;;  %v1124_v19 = vld [vmem:[#allocation5 + $0xe0] sm:$0xff]  ;;  %111 = vst [vmem:[#allocation1 + $0x2] ss:$4 sm:$0xff] %v95_v17  ;;  %v1115_v22 = vld [vmem:[#allocation5 + $0x98] sm:$0xff]  ;;  %v96_v26 = vld [vmem:[#allocation2 + $0x24] sm:$0x3f] }
  0x1e   :  { %545 = vmatpush.bf16.msra.mxu0 %v1101_v8  ;;  %v94_v25 = vld [vmem:[#allocation2 + $0x16] sm:$0x3f]  ;;  %v1106_v27 = vld [vmem:[#allocation5 + $0x50] sm:$0xff]  ;;  %115 = vst [vmem:[#allocation1 + $0x20] ss:$4 sm:$0xff] %v92_v24  ;;  %v1097_v32 = vld [vmem:[#allocation5 + $0x8] sm:$0xff] }
  0x1f   :  { %558 = vmatpush.bf16.msra.mxu1 %v1109_v9  ;;  %v1123_v28 = vld [vmem:[#allocation5 + $0xd8] sm:$0xff]  ;;  %117 = vst [vmem:[#allocation1 + $0x21] ss:$4 sm:$0xff] %v94_v25  ;;  %v1114_v30 = vld [vmem:[#allocation5 + $0x90] sm:$0xff]  ;;  %v1105_v33 = vld [vmem:[#allocation5 + $0x48] sm:$0xff] }
  0x20   :  { %571 = vmatpush.bf16.msra.mxu2 %v1117_v10  ;;  %v98_v29 = vld [vmem:[#allocation2 + $0x32] sm:$0x3f]  ;;  %119 = vst [vmem:[#allocation1 + $0x22] ss:$4 sm:$0xff] %v96_v26  ;;  %v1122_v31 = vld [vmem:[#allocation5 + $0xd0] sm:$0xff]  ;;  %v1113_v34 = vld [vmem:[#allocation5 + $0x88] sm:$0xff] }
  0x21   :  { %584 = vmatpush.bf16.msra.mxu3 %v1125_v11  ;;  %121 = vst [vmem:[#allocation1 + $0x23] ss:$4 sm:$0xff] %v98_v29  ;;  %v1096_v35 = vld [vmem:[#allocation5] sm:$0xff]  ;;  %v1121_v37 = vld [vmem:[#allocation5 + $0xc8] sm:$0xff]  ;;  %v1135_v40 = vld [vmem:[#allocation5 + $0x138] sm:$0xff] }
  0x22   :  { %546 = vmatpush.bf16.msra.mxu0 %v1100_v12  ;;  %v1104_v36 = vld [vmem:[#allocation5 + $0x40] sm:$0xff]  ;;  %v1143_v41 = vld [vmem:[#allocation5 + $0x178] sm:$0xff]  ;;  %v1134_v49 = vld [vmem:[#allocation5 + $0x130] sm:$0xff] }
  0x23   :  { %559 = vmatpush.bf16.msra.mxu1 %v1108_v13  ;;  %v1112_v42 = vld [vmem:[#allocation5 + $0x80] sm:$0xff]  ;;  %v1142_v50 = vld [vmem:[#allocation5 + $0x170] sm:$0xff]  ;;  %v1133_v53 = vld [vmem:[#allocation5 + $0x128] sm:$0xff] }
  0x24   :  { %572 = vmatpush.bf16.msra.mxu2 %v1116_v14  ;;  %v122_v38 = vld.sshfl [vmem:[#allocation1] sm:$0xff pattern:$0x73625140]  ;;  %v123_v39 = vld.sshfl [vmem:[#allocation1 + $0x8] sm:$0xff pattern:$0x73625140] }
  0x25   :  { %585 = vmatpush.bf16.msra.mxu3 %v1124_v19  ;;  %v124_v43 = vld.sshfl [vmem:[#allocation1 + $0x10] sm:$0xff pattern:$0x73625140]  ;;  %v136_v44 = vpack.c.bf16 %v122_v38, %v122_v38  ;;  %v137_v45 = vpack.c.bf16 %v123_v39, %v123_v39  ;;  %v1120_v46 = vld [vmem:[#allocation5 + $0xc0] sm:$0xff]  ;;  %v1141_v54 = vld [vmem:[#allocation5 + $0x168] sm:$0xff] }
  0x26   :  { %547 = vmatpush.bf16.msra.mxu0 %v1099_v20  ;;  %v1144_v47 = vld [vmem:[#allocation5 + $0x180] sm:$0xff]  ;;  %v125_v48 = vld.sshfl [vmem:[#allocation1 + $0x18] sm:$0xff pattern:$0x73625140]  ;;  %v138_v51 = vpack.c.bf16 %v124_v43, %v124_v43  ;;  %v1130_v60 = vld [vmem:[#allocation5 + $0x110] sm:$0xff] }
  0x27   :  { %560 = vmatpush.bf16.msra.mxu1 %v1107_v21  ;;  %v139_v52 = vpack.c.bf16 %v125_v48, %v125_v48  ;;  %v1132_v55 = vld [vmem:[#allocation5 + $0x120] sm:$0xff]  ;;  %v1131_v57 = vld [vmem:[#allocation5 + $0x118] sm:$0xff]  ;;  %v1138_v61 = vld [vmem:[#allocation5 + $0x150] sm:$0xff] }
  0x28   :  { %573 = vmatpush.bf16.msra.mxu2 %v1115_v22  ;;  %v1140_v56 = vld [vmem:[#allocation5 + $0x160] sm:$0xff]  ;;  %v1139_v58 = vld [vmem:[#allocation5 + $0x158] sm:$0xff]  ;;  %v128_v59 = vld.sshfl [vmem:[#allocation1 + $0x30] sm:$0xff pattern:$0x73625140] }
  0x29   :  { %586 = vmatpush.bf16.msra.mxu3 %v1123_v28  ;;  %v142_v62 = vpack.c.bf16 %v128_v59, %v128_v59  ;;  %v1129_v63 = vld [vmem:[#allocation5 + $0x108] sm:$0xff]  ;;  %v1128_v1 = vld [vmem:[#allocation5 + $0x100] sm:$0xff]  ;;  %v1151_v8 = vld [vmem:[#allocation7 + $0x30] sm:$0xff] }
  0x2a   :  { %548 = vmatpush.bf16.msra.mxu0 %v1098_v23  ;;  %v1137_v0 = vld [vmem:[#allocation5 + $0x148] sm:$0xff]  ;;  %v1136_v2 = vld [vmem:[#allocation5 + $0x140] sm:$0xff]  ;;  %v1150_v9 = vld [vmem:[#allocation7 + $0x28] sm:$0xff] }
  0x2b   :  { %561 = vmatpush.bf16.msra.mxu1 %v1106_v27  ;;  %v126_v3 = vld.sshfl [vmem:[#allocation1 + $0x20] sm:$0xff pattern:$0x73625140]  ;;  %v127_v4 = vld.sshfl [vmem:[#allocation1 + $0x28] sm:$0xff pattern:$0x73625140] }
  0x2c   :  { %574 = vmatpush.bf16.msra.mxu2 %v1114_v30  ;;  %v140_v5 = vpack.c.bf16 %v126_v3, %v126_v3  ;;  %v141_v6 = vpack.c.bf16 %v127_v4, %v127_v4  ;;  %v1152_v7 = vld [vmem:[#allocation7 + $0x38] sm:$0xff]  ;;  %v1149_v10 = vld [vmem:[#allocation7 + $0x20] sm:$0xff]  ;;  %v1147_v12 = vld [vmem:[#allocation7 + $0x10] sm:$0xff] }
  0x2d   :  { %587 = vmatpush.bf16.msra.mxu3 %v1122_v31  ;;  %v1148_v11 = vld [vmem:[#allocation7 + $0x18] sm:$0xff]  ;;  %v1146_v13 = vld [vmem:[#allocation7 + $0x8] sm:$0xff]  ;;  %v1145_v16 = vld [vmem:[#allocation7] sm:$0xff] }
  0x2e   :  { %549 = vmatpush.bf16.msra.mxu0 %v1097_v32  ;;  %v1160_v19 = vld [vmem:[#allocation8 + $0x38] sm:$0xff]  ;;  %v1159_v22 = vld [vmem:[#allocation8 + $0x30] sm:$0xff]  ;;  %v1158_v24 = vld [vmem:[#allocation8 + $0x28] sm:$0xff] }
  0x2f   :  { %562 = vmatpush.bf16.msra.mxu1 %v1105_v33  ;;  %v1172_v23 = vld [vmem:[%s1384_s2] ss:$0 sm:$0xff]  ;;  %v1157_v28 = vld [vmem:[#allocation8 + $0x20] sm:$0xff]  ;;  %v1155_v33 = vld [vmem:[#allocation8 + $0x10] sm:$0xff] }
  0x30   :  { %575 = vmatpush.bf16.msra.mxu2 %v1113_v34  ;;  %v1156_v30 = vld [vmem:[#allocation8 + $0x18] sm:$0xff] }
  0x31   :  { %588 = vmatpush.bf16.msra.mxu3 %v1121_v37 }
  0x32   :  { %550 = vmatpush.bf16.msra.mxu0 %v1096_v35 }
  0x33   :  { %563 = vmatpush.bf16.msra.mxu1 %v1104_v36 }
  0x34   :  { %576 = vmatpush.bf16.msra.mxu2 %v1112_v42 }
  0x35   :  { %551 = vmatmul.bf16.vlgmr.msra.gmra.mxu0 %v136_v44  ;;  %589 = vmatpush.bf16.msra.mxu3 %v1120_v46  ;;  %v1153_v46 = vld [vmem:[#allocation8] sm:$0xff] }
  0x36   :  { %595 = vmatpush.bf16.msrb.mxu0 %v1135_v40  ;;  %564 = vmatmul.bf16.vlgmr.msra.gmra.mxu1 %v137_v45  ;;  %v1154_v45 = vld [vmem:[#allocation8 + $0x8] sm:$0xff] }
  0x37   :  { %608 = vmatpush.bf16.msrb.mxu1 %v1143_v41  ;;  %577 = vmatmul.bf16.vlgmr.msra.gmra.mxu2 %v138_v51 }
  0x38   :  { %628 = vmatpush.bf16.msrb.mxu2 %v1144_v47  ;;  %590 = vmatmul.bf16.vlgmr.msra.gmra.mxu3 %v139_v52  ;;  %v1173_v47 = vld [vmem:[%s1386_s4] ss:$0 sm:$0xff] }
  0x39   :  { %704 = vmatpush.bf16.msrb.mxu3 %v1152_v7 }
  0x3a   :  { %596 = vmatpush.bf16.msrb.mxu0 %v1134_v49 }
  0x3b   :  { %609 = vmatpush.bf16.msrb.mxu1 %v1142_v50 }
  0x3c   :  { %787 = vmatpush.bf16.msra.mxu2 %v1160_v19 }
  0x3d   :  { %705 = vmatpush.bf16.msrb.mxu3 %v1151_v8 }
  0x3e   :  { %597 = vmatpush.bf16.msrb.mxu0 %v1133_v53  ;;  %v800_v53 = vlaneseq }
  0x3f   :  { %610 = vmatpush.bf16.msrb.mxu1 %v1141_v54 }
  0x40   :  { %788 = vmatpush.bf16.msra.mxu2 %v1159_v22  ;;  %v801_v54 = vand.u32 127, %v800_v53 }
  0x41   :  { %706 = vmatpush.bf16.msrb.mxu3 %v1150_v9 }
  0x42   :  { %598 = vmatpush.bf16.msrb.mxu0 %v1132_v55  ;;  %v1174_v55 = vld [vmem:[%s1388_s6] ss:$0 sm:$0xff]  ;;  %vm802_vm1 = vcmp.lt.s32.totalorder %v801_v54, 10 }
  0x43   :  { %611 = vmatpush.bf16.msrb.mxu1 %v1140_v56 }
  0x44   :  { %789 = vmatpush.bf16.msra.mxu2 %v1158_v24 }
  0x45   :  { %707 = vmatpush.bf16.msrb.mxu3 %v1149_v10 }
  0x46   :  { %599 = vmatpush.bf16.msrb.mxu0 %v1131_v57 }
  0x47   :  { %612 = vmatpush.bf16.msrb.mxu1 %v1139_v58  ;;  %1031 = vmatmul.msk.bf16.vlgmr.msrb.gmra.mxu2 %vm539_vm0, %v142_v62 }
  0x48   :  { %790 = vmatpush.bf16.msra.mxu2 %v1157_v28 }
  0x49   :  { %708 = vmatpush.bf16.msrb.mxu3 %v1148_v11 }
  0x4a   :  { %600 = vmatpush.bf16.msrb.mxu0 %v1130_v60 }
  0x4b   :  { %613 = vmatpush.bf16.msrb.mxu1 %v1138_v61 }
  0x4c   :  { %791 = vmatpush.bf16.msra.mxu2 %v1156_v30 }
  0x4d   :  { %709 = vmatpush.bf16.msrb.mxu3 %v1147_v12 }
  0x4e   :  { %601 = vmatpush.bf16.msrb.mxu0 %v1129_v63 }
  0x4f   :  { %614 = vmatpush.bf16.msrb.mxu1 %v1137_v0 }
  0x50   :  { %792 = vmatpush.bf16.msra.mxu2 %v1155_v33 }
  0x51   :  { %710 = vmatpush.bf16.msrb.mxu3 %v1146_v13 }
  0x52   :  { %602 = vmatpush.bf16.msrb.mxu0 %v1128_v1 }
  0x53   :  { %615 = vmatpush.bf16.msrb.mxu1 %v1136_v2 }
  0x54   :  { %793 = vmatpush.bf16.msra.mxu2 %v1154_v45 }
  0x55   :  { %603 = vmatmul.bf16.vlgmr.msrb.gmra.mxu0 %v140_v5  ;;  %711 = vmatpush.bf16.msrb.mxu3 %v1145_v16 }
  0x56   :  { %616 = vmatmul.bf16.vlgmr.msrb.gmra.mxu1 %v141_v6 }
  0x58   :  { %794 = vmatpush.bf16.msra.mxu2 %v1153_v46 }
  0xb2   :  { %v552_v14 = vpop.f32.mrf.mxu0 }
  0xb3   :  { %v565_v15 = vpop.f32.mrf.mxu1  ;;  %v553_v25 = vadd.f32 %v1172_v23, %v552_v14 }
  0xb5   :  { %v566_v29 = vadd.f32 %v565_v15, %v553_v25 }
  0xba   :  { %v554_v17 = vpop.f32.mrf.mxu0  ;;  %v578_v20 = vpop.f32.mrf.mxu2 }
  0xbb   :  { %v567_v18 = vpop.f32.mrf.mxu1  ;;  %v591_v21 = vpop.f32.mrf.mxu3  ;;  %v579_v31 = vadd.f32 %v578_v20, %v566_v29 }
  0xbd   :  { %v592_v34 = vadd.f32 %v591_v21, %v579_v31 }
  0xc2   :  { %v580_v26 = vpop.f32.mrf.mxu2 }
  0xc3   :  { %v593_v27 = vpop.f32.mrf.mxu3 }
  0xca   :  { %v630_v32 = vpop.f32.mrf.mxu2 }
  0xd2   :  { %v604_v35 = vpop.f32.mrf.mxu0  ;;  %v632_v39 = vpop.f32.mrf.mxu2 }
  0xd3   :  { %v617_v36 = vpop.f32.mrf.mxu1  ;;  %v605_v37 = vadd.f32 %v604_v35, %v592_v34 }
  0xd5   :  { %v618_v38 = vadd.f32 %v617_v36, %v605_v37 }
  0xd7   :  { %v631_v40 = vadd.f32 %v630_v32, %v618_v38 }
  0xd9   :  { %v634_v41 = vmax.f32 %v631_v40, 0.0 }
  0xda   :  { %v606_v42 = vpop.f32.mrf.mxu0 }
  0xdb   :  { %v619_v43 = vpop.f32.mrf.mxu1  ;;  %v635_v44 = vpack.c.bf16 %v634_v41, %v634_v41 }
  0xdd   :  { %712 = vmatmul.bf16.vlgmr.msrb.gmra.mxu3 %v635_v44 }
 0x160   :  { %v713_v48 = vpop.f32.mrf.mxu3 }
 0x161   :  { %v714_v49 = vadd.f32 %v1173_v47, %v713_v48 }
 0x163   :  { %v717_v50 = vmax.f32 %v714_v49, 0.0 }
 0x165   :  { %v718_v51 = vpack.c.bf16 %v717_v50, %v717_v50 }
 0x167   :  { %795 = vmatmul.bf16.vlgmr.msra.gmra.mxu2 %v718_v51 }
 0x168   :  { %v715_v52 = vpop.f32.mrf.mxu3 }
 0x1ea   :  { %v796_v56 = vpop.f32.mrf.mxu2 }
 0x1eb   :  { %v797_v57 = vadd.f32 %v1174_v55, %v796_v56 }
 0x1ed   :  { %v803_v58 = vsel %vm802_vm1, %v797_v57, -1e+30 }
 0x1ee   :  { %804 = vmax.xlane.f32.xlu0 %v803_v58 }
 0x1f2   :  { %v798_v59 = vpop.f32.mrf.mxu2 }
 0x261   :  { %v805_v60 = vpop.xlane.xlu0 %804 }
 0x262   :  { %v806_v61 = vsub.f32 %v803_v58, %v805_v60 }
 0x264   :  { %v807_v62 = vmul.f32 1.442695, %v806_v61 }
 0x266   :  { %1175 = vpow2.f32 %v807_v62 }
 0x26c   :  { %v1176_v63 = vpop.eup %1175 }
 0x26d   :  { %809 = vadd.xlane.f32.xlu0 %v1176_v63 }
 0x2e0   :  { %v810_v0 = vpop.xlane.xlu0 %809 }
 0x2e1   :  { %1177 = vrcp.f32 %v810_v0 }
 0x2e7   :  { %v1178_v1 = vpop.eup %1177 }
 0x2e8   :  { %v812_v2 = vmul.f32 %v1178_v1, %v1176_v63 }
 0x2ea   :  { %813 = vst [vmem:[#allocation10] sm:$0xff] %v812_v2 }
 0x2eb   :  { %817 = vsyncadd [#allocation4], 96  ;;  %s820_s26 = sshll.u32 %s1389_s7, 4  ;;  %s1315_s27 = smov [#allocation10]   ;;  %s821_s26 = int_to_ptr.hbm [resolvable:$true] %s820_s26 }
 0x2ec   :  { %s818_s28 = sshll.u32 %s1315_s27, 4  ;;  %s1316_s29 = smov 32   ;;  %s819_s28 = int_to_ptr.vmem [resolvable:$true] %s818_s28 }
 0x2ed   :  { %s1317_s30 = smov 2  }
 0x2ee   :  { %826 = dma.vmem_to_hbm [thread:$0]  %s819_s28, 32, %s821_s26, [#allocation4], %s1316_s29, %s1316_s29, %s1317_s30  }
 0x2ef   :  { %1305 = dma.done.wait [#allocation4], 128  }
 0x2f0   :  { %1306 = vsyncadd [#allocation4], 4294967168 }
 0x2f1   :  { %831 = vsyncpa [#allocation3], 1 }
 0x2f2   :  { %832 = vsyncpa [#allocation6], 1 }
 0x2f3   :  { %833 = vsyncpa [#allocation9], 1 }
 0x2f4   :  { %834 = vsyncpa [#allocation4], 1 }

</bundles_post_ra>
